<compile_context>
chip_gen: v7x
topology: tpu7x:2x2x1
jax: 0.10.0
libtpu: 0.0.40
codegen_flags: <defaults>
</compile_context>

<pallas_src>
import functools
import math

import jax
import jax.numpy as jnp
from jax.experimental import pallas as pl
from jax.experimental.pallas import tpu as pltpu


# ---------------------------------------------------------------- GELU helper
def _gelu(x):
    # tanh-approximation GELU: 0.5*x*(1+tanh(sqrt(2/pi)*(x + 0.044715*x^3)))
    c = math.sqrt(2.0 / math.pi)
    return 0.5 * x * (1.0 + jnp.tanh(c * (x + 0.044715 * x * x * x)))


def _round_up(n, m):
    return ((n + m - 1) // m) * m


# ------------------------------------------------------------- fused kernel
def _fused_classifier_kernel(*refs, n_fc, matmul_dtype):
    # refs = (x, wconv, bconv, negmask, [w_fc0, b_fc0, w_fc1, b_fc1, ...], out)
    x_ref, wconv_ref, bconv_ref, mask_ref = refs[:4]
    fc_refs = refs[4:4 + 2 * n_fc]
    o_ref = refs[4 + 2 * n_fc]

    B, L, E = x_ref.shape
    KE, F_pad = wconv_ref.shape
    K_max = KE // E
    T_pad = mask_ref.shape[0]

    # ---- im2col: build the (B*T_pad, K_max*E) unfolded activation ----------
    # (static unroll: B and K_max are tiny; rows beyond the sequence are zero,
    #  which is exact because the stacked conv weight is zero on padded taps)
    segs = []
    for b_i in range(B):
        xb = x_ref[b_i]                               # (L, E)
        taps = []
        for j in range(K_max):
            blk = xb[j:L, :]                          # (L - j, E)
            pad_rows = T_pad - (L - j)
            if pad_rows > 0:
                blk = jnp.concatenate(
                    [blk, jnp.zeros((pad_rows, E), blk.dtype)], axis=0)
            taps.append(blk)
        segs.append(jnp.concatenate(taps, axis=-1))   # (T_pad, K_max*E)
    unf = jnp.concatenate(segs, axis=0)               # (B*T_pad, K_max*E)

    # ---- all conv branches in ONE MXU matmul, f32 accumulation -------------
    conv = jnp.dot(unf.astype(matmul_dtype),
                   wconv_ref[...].astype(matmul_dtype),
                   preferred_element_type=jnp.float32)        # (B*T_pad, F_pad)
    g = _gelu(conv + bconv_ref[...])                          # bias + GELU (f32)

    # ---- per-branch-valid-length masked max-pool over time -----------------
    neg = mask_ref[...]                                       # (T_pad, F_pad)
    pooled = jnp.concatenate(
        [jnp.max(g[b_i * T_pad:(b_i + 1) * T_pad, :] + neg,
                 axis=0, keepdims=True) for b_i in range(B)],
        axis=0)                                               # (B, F_pad)

    # TODO(synk): nn.Dropout -> identity (eval-mode semantics); training-mode
    # parity would need pltpu.prng_seed / pltpu.prng_random_bits masking.

    # ---- fully connected stack, chained in-register/VMEM -------------------
    h = pooled
    for i in range(n_fc):
        w = fc_refs[2 * i][...]
        b = fc_refs[2 * i + 1][...]
        h = jnp.dot(h.astype(matmul_dtype), w.astype(matmul_dtype),
                    preferred_element_type=jnp.float32) + b
        if i < n_fc - 1:                                      # GELU on all but last
            h = _gelu(h)

    o_ref[...] = h.astype(o_ref.dtype)                        # lane-dense store


def _full_spec(a):
    zeros = (0,) * a.ndim
    return pl.BlockSpec(a.shape, lambda i, _z=zeros: _z)


def classifier_forward(packed, latent, *, matmul_dtype=jnp.float32):
    # latent: (B, max_seq_len + 2, emb_dim) float32  ->  (B, num_classes)
    B = latent.shape[0]
    n_fc = len(packed["fcs"])
    fc_arrays = [a for wb in packed["fcs"] for a in wb]
    out_pad = packed["fcs"][-1][0].shape[1]       # lane-padded class dim

    inputs = [latent, packed["wconv"], packed["bconv"], packed["negmask"],
              *fc_arrays]

    kernel = functools.partial(_fused_classifier_kernel,
                               n_fc=n_fc, matmul_dtype=matmul_dtype)

    out = pl.pallas_call(
        kernel,
        out_shape=jax.ShapeDtypeStruct((B, out_pad), jnp.float32),
        grid=(1,),
        in_specs=[_full_spec(a) for a in inputs],
        out_specs=pl.BlockSpec((B, out_pad), lambda i: (0, 0)),
        compiler_params=pltpu.CompilerParams(
            dimension_semantics=("arbitrary",)),
    )(*inputs)
    return out[:, :packed["out_dim"]]


# --------------------------------------------------------------- param init
def _xavier_uniform(key, shape, fan_in, fan_out):
    bound = math.sqrt(6.0 / (fan_in + fan_out))
    return jax.random.uniform(key, shape, jnp.float32, -bound, bound)


def init_classifier_params(key, emb_dim, kernel_sizes, fc_sizes, num_filters):
    params = {"convs": [], "fcs": []}
    keys = jax.random.split(key, len(kernel_sizes) + len(fc_sizes) - 1)
    # Conv1d(emb_dim, num_filters, k): PyTorch weight (F, E, k);
    # xavier fans: fan_in = E*k, fan_out = F*k.  Stored here tap-major (k, E, F).
    for i, k in enumerate(kernel_sizes):
        w = _xavier_uniform(keys[i], (k, emb_dim, num_filters),
                            fan_in=emb_dim * k, fan_out=num_filters * k)
        b = jnp.zeros((1, num_filters), jnp.float32)
        params["convs"].append((w, b, k))
    # Linear(fc_sizes[i], fc_sizes[i+1]): PyTorch weight (out, in); stored (in, out).
    for j in range(len(fc_sizes) - 1):
        din, dout = fc_sizes[j], fc_sizes[j + 1]
        w = _xavier_uniform(keys[len(kernel_sizes) + j], (din, dout),
                            fan_in=din, fan_out=dout)
        b = jnp.zeros((1, dout), jnp.float32)
        params["fcs"].append((w, b))
    return params


def pack_classifier_params(params, seq_len):
    """Stack / zero-pad all parameters for the fused, lane-dense kernel."""
    L = seq_len
    convs = params["convs"]
    ks = [k for (_, _, k) in convs]
    K_max = max(ks)
    E = convs[0][0].shape[1]
    F = convs[0][0].shape[2]
    F_tot = len(convs) * F
    F_pad = _round_up(F_tot, 128)
    T_pad = _round_up(L, 8)

    wconv = jnp.zeros((K_max * E, F_pad), jnp.float32)
    bconv = jnp.zeros((1, F_pad), jnp.float32)
    negmask = jnp.zeros((T_pad, F_pad), jnp.float32)
    for r, (w, b, k) in enumerate(convs):
        # weight rows ordered (tap j, channel e) -> matches in-kernel im2col
        wconv = wconv.at[:k * E, r * F:(r + 1) * F].set(w.reshape(k * E, F))
        bconv = bconv.at[:, r * F:(r + 1) * F].set(b)
        T_r = L - k + 1                      # valid conv-output length
        negmask = negmask.at[T_r:, r * F:(r + 1) * F].set(-1e30)

    fcs = []
    prev_pad = F_pad
    for (w, b) in params["fcs"]:
        din, dout = w.shape
        assert din <= prev_pad
        dpad = _round_up(dout, 128)
        wp = jnp.zeros((prev_pad, dpad), jnp.float32).at[:din, :dout].set(w)
        bp = jnp.zeros((1, dpad), jnp.float32).at[:, :dout].set(b)
        fcs.append((wp, bp))
        prev_pad = dpad

    return {"wconv": wconv, "bconv": bconv, "negmask": negmask,
            "fcs": fcs, "out_dim": params["fcs"][-1][0].shape[1]}


# ------------------------------------------------------- pure-JAX reference
def _reference_forward(params, latent):
    conv_outs = []
    L = latent.shape[1]
    for (w, b, k) in params["convs"]:
        T = L - k + 1
        acc = jnp.zeros((latent.shape[0], T, w.shape[2]), jnp.float32)
        for j in range(k):
            acc = acc + jnp.einsum('ble,ef->blf', latent[:, j:j + T, :], w[j])
        g = _gelu(acc + b[None])
        conv_outs.append(jnp.max(g, axis=1))
    x = jnp.concatenate(conv_outs, axis=1)
    n_fc = len(params["fcs"])
    for i, (w, b) in enumerate(params["fcs"]):
        x = x @ w + b
        if i < n_fc - 1:
            x = _gelu(x)
    return x


if __name__ == "__main__":
    # Small, shape-consistent configuration.
    emb_dim = 32
    max_seq_len = 14            # -> sequence length L = max_seq_len + 2 = 16
    kernel_sizes = [3, 4, 5]
    num_filters = 8
    fc_sizes = [num_filters * len(kernel_sizes), 32, 4]   # 24 -> 32 -> 4
    B = 2
    L = max_seq_len + 2

    key = jax.random.PRNGKey(0)
    k_params, k_input = jax.random.split(key)
    params = init_classifier_params(k_params, emb_dim, kernel_sizes,
                                    fc_sizes, num_filters)
    packed = pack_classifier_params(params, L)
    latent = jax.random.normal(k_input, (B, L, emb_dim), dtype=jnp.float32)

    out = classifier_forward(packed, latent)
    out = jax.block_until_ready(out)
    assert out.shape == (B, fc_sizes[-1]), out.shape

    ref = _reference_forward(params, latent)
    assert jnp.allclose(out, ref, rtol=1e-4, atol=1e-4), (out, ref)

    print("KERNEL_OK")
</pallas_src>

<mosaic_0001>
module attributes {stable_mosaic.version = 11 : i64} {
  func.func @_fused_classifier_kernel(%arg0: i32, %arg1: memref<2x16x32xf32, #tpu.memory_space<vmem>>, %arg2: memref<160x128xf32, #tpu.memory_space<vmem>>, %arg3: memref<1x128xf32, #tpu.memory_space<vmem>>, %arg4: memref<16x128xf32, #tpu.memory_space<vmem>>, %arg5: memref<128x128xf32, #tpu.memory_space<vmem>>, %arg6: memref<1x128xf32, #tpu.memory_space<vmem>>, %arg7: memref<128x128xf32, #tpu.memory_space<vmem>>, %arg8: memref<1x128xf32, #tpu.memory_space<vmem>>, %arg9: memref<2x128xf32, #tpu.memory_space<vmem>>) attributes {dimension_semantics = [#tpu.dimension_semantics<arbitrary>], iteration_bounds = array<i64: 1>, scalar_prefetch = 0 : i64, scratch_operands = 0 : i64, tpu.core_type = #tpu.core_type<tc>, window_params = [{pipeline_mode = #tpu.pipeline_mode<synchronous>, transform_indices = @transform_0, window_bounds = array<i64: 2, 16, 32>}, {pipeline_mode = #tpu.pipeline_mode<synchronous>, transform_indices = @transform_1, window_bounds = array<i64: 160, 128>}, {pipeline_mode = #tpu.pipeline_mode<synchronous>, transform_indices = @transform_2, window_bounds = array<i64: 1, 128>}, {pipeline_mode = #tpu.pipeline_mode<synchronous>, transform_indices = @transform_3, window_bounds = array<i64: 16, 128>}, {pipeline_mode = #tpu.pipeline_mode<synchronous>, transform_indices = @transform_4, window_bounds = array<i64: 128, 128>}, {pipeline_mode = #tpu.pipeline_mode<synchronous>, transform_indices = @transform_5, window_bounds = array<i64: 1, 128>}, {pipeline_mode = #tpu.pipeline_mode<synchronous>, transform_indices = @transform_6, window_bounds = array<i64: 128, 128>}, {pipeline_mode = #tpu.pipeline_mode<synchronous>, transform_indices = @transform_7, window_bounds = array<i64: 1, 128>}, {pipeline_mode = #tpu.pipeline_mode<synchronous>, transform_indices = @transform_8, window_bounds = array<i64: 2, 128>}]} {
    %c0 = arith.constant 0 : index
    %c0_0 = arith.constant 0 : index
    %c0_1 = arith.constant 0 : index
    %0 = vector.load %arg1[%c0, %c0_0, %c0_1] : memref<2x16x32xf32, #tpu.memory_space<vmem>>, vector<1x16x32xf32>
    %1 = vector.shape_cast %0 : vector<1x16x32xf32> to vector<16x32xf32>
    %2 = vector.extract_strided_slice %1 {offsets = [1, 0], sizes = [15, 32], strides = [1, 1]} : vector<16x32xf32> to vector<15x32xf32>
    %cst = arith.constant 0.000000e+00 : f32
    %3 = vector.broadcast %cst : f32 to vector<1x32xf32>
    %4 = tpu.concatenate %2, %3 in 0 : vector<15x32xf32>, vector<1x32xf32> -> vector<16x32xf32>
    %5 = vector.extract_strided_slice %1 {offsets = [2, 0], sizes = [14, 32], strides = [1, 1]} : vector<16x32xf32> to vector<14x32xf32>
    %cst_2 = arith.constant 0.000000e+00 : f32
    %6 = vector.broadcast %cst_2 : f32 to vector<2x32xf32>
    %7 = tpu.concatenate %5, %6 in 0 : vector<14x32xf32>, vector<2x32xf32> -> vector<16x32xf32>
    %8 = vector.extract_strided_slice %1 {offsets = [3, 0], sizes = [13, 32], strides = [1, 1]} : vector<16x32xf32> to vector<13x32xf32>
    %cst_3 = arith.constant 0.000000e+00 : f32
    %9 = vector.broadcast %cst_3 : f32 to vector<3x32xf32>
    %10 = tpu.concatenate %8, %9 in 0 : vector<13x32xf32>, vector<3x32xf32> -> vector<16x32xf32>
    %11 = vector.extract_strided_slice %1 {offsets = [4, 0], sizes = [12, 32], strides = [1, 1]} : vector<16x32xf32> to vector<12x32xf32>
    %cst_4 = arith.constant 0.000000e+00 : f32
    %12 = vector.broadcast %cst_4 : f32 to vector<4x32xf32>
    %13 = tpu.concatenate %11, %12 in 0 : vector<12x32xf32>, vector<4x32xf32> -> vector<16x32xf32>
    %14 = tpu.concatenate %1, %4, %7, %10, %13 in 1 : vector<16x32xf32>, vector<16x32xf32>, vector<16x32xf32>, vector<16x32xf32>, vector<16x32xf32> -> vector<16x160xf32>
    %c1 = arith.constant 1 : index
    %c0_5 = arith.constant 0 : index
    %c0_6 = arith.constant 0 : index
    %15 = vector.load %arg1[%c1, %c0_5, %c0_6] : memref<2x16x32xf32, #tpu.memory_space<vmem>>, vector<1x16x32xf32>
    %16 = vector.shape_cast %15 : vector<1x16x32xf32> to vector<16x32xf32>
    %17 = vector.extract_strided_slice %16 {offsets = [1, 0], sizes = [15, 32], strides = [1, 1]} : vector<16x32xf32> to vector<15x32xf32>
    %cst_7 = arith.constant 0.000000e+00 : f32
    %18 = vector.broadcast %cst_7 : f32 to vector<1x32xf32>
    %19 = tpu.concatenate %17, %18 in 0 : vector<15x32xf32>, vector<1x32xf32> -> vector<16x32xf32>
    %20 = vector.extract_strided_slice %16 {offsets = [2, 0], sizes = [14, 32], strides = [1, 1]} : vector<16x32xf32> to vector<14x32xf32>
    %cst_8 = arith.constant 0.000000e+00 : f32
    %21 = vector.broadcast %cst_8 : f32 to vector<2x32xf32>
    %22 = tpu.concatenate %20, %21 in 0 : vector<14x32xf32>, vector<2x32xf32> -> vector<16x32xf32>
    %23 = vector.extract_strided_slice %16 {offsets = [3, 0], sizes = [13, 32], strides = [1, 1]} : vector<16x32xf32> to vector<13x32xf32>
    %cst_9 = arith.constant 0.000000e+00 : f32
    %24 = vector.broadcast %cst_9 : f32 to vector<3x32xf32>
    %25 = tpu.concatenate %23, %24 in 0 : vector<13x32xf32>, vector<3x32xf32> -> vector<16x32xf32>
    %26 = vector.extract_strided_slice %16 {offsets = [4, 0], sizes = [12, 32], strides = [1, 1]} : vector<16x32xf32> to vector<12x32xf32>
    %cst_10 = arith.constant 0.000000e+00 : f32
    %27 = vector.broadcast %cst_10 : f32 to vector<4x32xf32>
    %28 = tpu.concatenate %26, %27 in 0 : vector<12x32xf32>, vector<4x32xf32> -> vector<16x32xf32>
    %29 = tpu.concatenate %16, %19, %22, %25, %28 in 1 : vector<16x32xf32>, vector<16x32xf32>, vector<16x32xf32>, vector<16x32xf32>, vector<16x32xf32> -> vector<16x160xf32>
    %30 = tpu.concatenate %14, %29 in 0 : vector<16x160xf32>, vector<16x160xf32> -> vector<32x160xf32>
    %c0_11 = arith.constant 0 : index
    %c0_12 = arith.constant 0 : index
    %31 = vector.load %arg2[%c0_11, %c0_12] : memref<160x128xf32, #tpu.memory_space<vmem>>, vector<160x128xf32>
    %cst_13 = arith.constant dense<0.000000e+00> : vector<32x128xf32>
    %32 = tpu.matmul %30, %31, %cst_13 {dimension_numbers = #tpu.dot_dimension_numbers<[1], [0], [0], [1], [0, 0, 1, 1], [], []>} : vector<32x160xf32>, vector<160x128xf32>, vector<32x128xf32> -> vector<32x128xf32>
    %c0_14 = arith.constant 0 : index
    %c0_15 = arith.constant 0 : index
    %33 = vector.load %arg3[%c0_14, %c0_15] : memref<1x128xf32, #tpu.memory_space<vmem>>, vector<1x128xf32>
    %34 = vector.broadcast %33 : vector<1x128xf32> to vector<32x128xf32>
    %35 = arith.addf %32, %34 : vector<32x128xf32>
    %cst_16 = arith.constant 5.000000e-01 : f32
    %36 = vector.broadcast %cst_16 : f32 to vector<32x128xf32>
    %37 = arith.mulf %36, %35 : vector<32x128xf32>
    %cst_17 = arith.constant 4.471500e-02 : f32
    %38 = vector.broadcast %cst_17 : f32 to vector<32x128xf32>
    %39 = arith.mulf %38, %35 : vector<32x128xf32>
    %40 = arith.mulf %39, %35 : vector<32x128xf32>
    %41 = arith.mulf %40, %35 : vector<32x128xf32>
    %42 = arith.addf %35, %41 : vector<32x128xf32>
    %cst_18 = arith.constant 0.797884583 : f32
    %43 = vector.broadcast %cst_18 : f32 to vector<32x128xf32>
    %44 = arith.mulf %43, %42 : vector<32x128xf32>
    %45 = math.tanh %44 : vector<32x128xf32>
    %cst_19 = arith.constant 1.000000e+00 : f32
    %46 = vector.broadcast %cst_19 : f32 to vector<32x128xf32>
    %47 = arith.addf %46, %45 : vector<32x128xf32>
    %48 = arith.mulf %37, %47 : vector<32x128xf32>
    %c0_20 = arith.constant 0 : index
    %c0_21 = arith.constant 0 : index
    %49 = vector.load %arg4[%c0_20, %c0_21] : memref<16x128xf32, #tpu.memory_space<vmem>>, vector<16x128xf32>
    %50 = vector.extract_strided_slice %48 {offsets = [0, 0], sizes = [16, 128], strides = [1, 1]} : vector<32x128xf32> to vector<16x128xf32>
    %51 = arith.addf %50, %49 : vector<16x128xf32>
    %cst_22 = arith.constant dense<0xFF800000> : vector<128xf32>
    %52 = vector.multi_reduction <maximumf>, %51, %cst_22 [0] : vector<16x128xf32> to vector<128xf32>
    %53 = vector.shape_cast %52 : vector<128xf32> to vector<1x128xf32>
    %54 = vector.extract_strided_slice %48 {offsets = [16, 0], sizes = [16, 128], strides = [1, 1]} : vector<32x128xf32> to vector<16x128xf32>
    %55 = arith.addf %54, %49 : vector<16x128xf32>
    %cst_23 = arith.constant dense<0xFF800000> : vector<128xf32>
    %56 = vector.multi_reduction <maximumf>, %55, %cst_23 [0] : vector<16x128xf32> to vector<128xf32>
    %57 = vector.shape_cast %56 : vector<128xf32> to vector<1x128xf32>
    %58 = tpu.concatenate %53, %57 in 0 : vector<1x128xf32>, vector<1x128xf32> -> vector<2x128xf32>
    %c0_24 = arith.constant 0 : index
    %c0_25 = arith.constant 0 : index
    %59 = vector.load %arg5[%c0_24, %c0_25] : memref<128x128xf32, #tpu.memory_space<vmem>>, vector<128x128xf32>
    %c0_26 = arith.constant 0 : index
    %c0_27 = arith.constant 0 : index
    %60 = vector.load %arg6[%c0_26, %c0_27] : memref<1x128xf32, #tpu.memory_space<vmem>>, vector<1x128xf32>
    %cst_28 = arith.constant dense<0.000000e+00> : vector<2x128xf32>
    %61 = tpu.matmul %58, %59, %cst_28 {dimension_numbers = #tpu.dot_dimension_numbers<[1], [0], [0], [1], [0, 0, 1, 1], [], []>} : vector<2x128xf32>, vector<128x128xf32>, vector<2x128xf32> -> vector<2x128xf32>
    %62 = vector.broadcast %60 : vector<1x128xf32> to vector<2x128xf32>
    %63 = arith.addf %61, %62 : vector<2x128xf32>
    %cst_29 = arith.constant 5.000000e-01 : f32
    %64 = vector.broadcast %cst_29 : f32 to vector<2x128xf32>
    %65 = arith.mulf %64, %63 : vector<2x128xf32>
    %cst_30 = arith.constant 4.471500e-02 : f32
    %66 = vector.broadcast %cst_30 : f32 to vector<2x128xf32>
    %67 = arith.mulf %66, %63 : vector<2x128xf32>
    %68 = arith.mulf %67, %63 : vector<2x128xf32>
    %69 = arith.mulf %68, %63 : vector<2x128xf32>
    %70 = arith.addf %63, %69 : vector<2x128xf32>
    %cst_31 = arith.constant 0.797884583 : f32
    %71 = vector.broadcast %cst_31 : f32 to vector<2x128xf32>
    %72 = arith.mulf %71, %70 : vector<2x128xf32>
    %73 = math.tanh %72 : vector<2x128xf32>
    %cst_32 = arith.constant 1.000000e+00 : f32
    %74 = vector.broadcast %cst_32 : f32 to vector<2x128xf32>
    %75 = arith.addf %74, %73 : vector<2x128xf32>
    %76 = arith.mulf %65, %75 : vector<2x128xf32>
    %c0_33 = arith.constant 0 : index
    %c0_34 = arith.constant 0 : index
    %77 = vector.load %arg7[%c0_33, %c0_34] : memref<128x128xf32, #tpu.memory_space<vmem>>, vector<128x128xf32>
    %c0_35 = arith.constant 0 : index
    %c0_36 = arith.constant 0 : index
    %78 = vector.load %arg8[%c0_35, %c0_36] : memref<1x128xf32, #tpu.memory_space<vmem>>, vector<1x128xf32>
    %cst_37 = arith.constant dense<0.000000e+00> : vector<2x128xf32>
    %79 = tpu.matmul %76, %77, %cst_37 {dimension_numbers = #tpu.dot_dimension_numbers<[1], [0], [0], [1], [0, 0, 1, 1], [], []>} : vector<2x128xf32>, vector<128x128xf32>, vector<2x128xf32> -> vector<2x128xf32>
    %80 = vector.broadcast %78 : vector<1x128xf32> to vector<2x128xf32>
    %81 = arith.addf %79, %80 : vector<2x128xf32>
    %c0_38 = arith.constant 0 : index
    %c0_39 = arith.constant 0 : index
    %82 = vector.load %arg9[%c0_38, %c0_39] : memref<2x128xf32, #tpu.memory_space<vmem>>, vector<2x128xf32>
    tpu.vector_store %arg9[%c0_38, %c0_39], %81 {strides = array<i32>} : memref<2x128xf32, #tpu.memory_space<vmem>>, vector<2x128xf32>,
    return
  }
  func.func @transform_0(%arg0: i32) -> (i32, i32, i32) {
    %c0_i32 = arith.constant 0 : i32
    %c0_i32_0 = arith.constant 0 : i32
    %c0_i32_1 = arith.constant 0 : i32
    %c0_i32_2 = arith.constant 0 : i32
    return %c0_i32, %c0_i32_0, %c0_i32_1 : i32, i32, i32
  }
  func.func @transform_1(%arg0: i32) -> (i32, i32) {
    %c0_i32 = arith.constant 0 : i32
    %c0_i32_0 = arith.constant 0 : i32
    %c0_i32_1 = arith.constant 0 : i32
    return %c0_i32, %c0_i32_0 : i32, i32
  }
  func.func @transform_2(%arg0: i32) -> (i32, i32) {
    %c0_i32 = arith.constant 0 : i32
    %c0_i32_0 = arith.constant 0 : i32
    %c0_i32_1 = arith.constant 0 : i32
    return %c0_i32, %c0_i32_0 : i32, i32
  }
  func.func @transform_3(%arg0: i32) -> (i32, i32) {
    %c0_i32 = arith.constant 0 : i32
    %c0_i32_0 = arith.constant 0 : i32
    %c0_i32_1 = arith.constant 0 : i32
    return %c0_i32, %c0_i32_0 : i32, i32
  }
  func.func @transform_4(%arg0: i32) -> (i32, i32) {
    %c0_i32 = arith.constant 0 : i32
    %c0_i32_0 = arith.constant 0 : i32
    %c0_i32_1 = arith.constant 0 : i32
    return %c0_i32, %c0_i32_0 : i32, i32
  }
  func.func @transform_5(%arg0: i32) -> (i32, i32) {
    %c0_i32 = arith.constant 0 : i32
    %c0_i32_0 = arith.constant 0 : i32
    %c0_i32_1 = arith.constant 0 : i32
    return %c0_i32, %c0_i32_0 : i32, i32
  }
  func.func @transform_6(%arg0: i32) -> (i32, i32) {
    %c0_i32 = arith.constant 0 : i32
    %c0_i32_0 = arith.constant 0 : i32
    %c0_i32_1 = arith.constant 0 : i32
    return %c0_i32, %c0_i32_0 : i32, i32
  }
  func.func @transform_7(%arg0: i32) -> (i32, i32) {
    %c0_i32 = arith.constant 0 : i32
    %c0_i32_0 = arith.constant 0 : i32
    %c0_i32_1 = arith.constant 0 : i32
    return %c0_i32, %c0_i32_0 : i32, i32
  }
  func.func @transform_8(%arg0: i32) -> (i32, i32) {
    %c0_i32 = arith.constant 0 : i32
    %c0_i32_0 = arith.constant 0 : i32
    %c0_i32_1 = arith.constant 0 : i32
    return %c0_i32, %c0_i32_0 : i32, i32
  }
}

</mosaic_0001>

<bundles_post_ra>
// kernel: tpu_custom_call.1
= control target key start
LH: loop header
LB: loop body
LE: loop exit
PB: predicated region body
PF: predicated region fallthrough
CT: control target
= control target key end

     0   :  { %13 = vsyncpa [#allocation3], 0  ;;  %s1237_s0 = inlined_call_operand.hbm [shape: f32[2,16,32], index: 0, kind: input, shape index: {}]   ;;  %s1238_s1 = inlined_call_operand.hbm [shape: f32[160,128], index: 1, kind: input, shape index: {}]   ;;  %s1239_s2 = inlined_call_operand.vmem [shape: f32[1,128], index: 2, kind: input, shape index: {}]   ;;  %s1240_s3 = inlined_call_operand.hbm [shape: f32[16,128], index: 3, kind: input, shape index: {}]   ;;  %s1241_s4 = inlined_call_operand.hbm [shape: f32[128,128], index: 4, kind: input, shape index: {}]   ;;  %s1242_s5 = inlined_call_operand.vmem [shape: f32[1,128], index: 5, kind: input, shape index: {}]   ;;  %s1243_s6 = inlined_call_operand.hbm [shape: f32[128,128], index: 6, kind: input, shape index: {}]   ;;  %s1244_s7 = inlined_call_operand.vmem [shape: f32[1,128], index: 7, kind: input, shape index: {}]   ;;  %s1245_s8 = inlined_call_operand.hbm [shape: f32[2,128], index: 8, kind: output, shape index: {}]  }
   0x1   :  { %14 = vsyncpa [#allocation6], 0 }
   0x2   :  { %15 = vsyncpa [#allocation9], 0 }
   0x3   :  { %16 = vsyncpa [#allocation4], 0  ;;  %s969_s27 = smov [#allocation5]   ;;  %s970_s29 = smov [#allocation8]  }
   0x4   :  { %s34_s28 = sshll.u32 %s969_s27, 4  ;;  %s60_s30 = sshll.u32 %s970_s29, 4  ;;  %s35_s28 = int_to_ptr.vmem [resolvable:$true] %s34_s28  ;;  %s1028_s30 = int_to_ptr.vmem [resolvable:$true] %s60_s30 }
   0x5   :  { %s829_s11 = scalar_lea.hbm %s1238_s1, 2560 }
   0x6   :  { %p830_p0 = scmp.ne.s32.totalorder %s1238_s1, %s829_s11  ;;  %p833_p1 = scmp.lt.u32.totalorder %s829_s11, %s1238_s1 }
   0x8   :  { %p835_p2 = pnand %p833_p1, %p830_p0 }
   0xa   :  { %838 = shalt.err (!%p835_p2)
}
   0xb   :  { %s839_s16 = scalar_lea.vmem %s35_s28, 2560  ;;  %p844_p4 = scmp.lt.s32.totalorder %s35_s28, %s35_s28 }
   0xc   :  { %p840_p3 = scmp.ne.s32.totalorder %s35_s28, %s839_s16  ;;  %p845_p5 = scmp.lt.s32.totalorder %s839_s16, %s839_s16 }
   0xe   :  { %p846_p6 = por %p845_p5, %p844_p4 }
  0x10   :  { %p847_p7 = pnand %p846_p6, %p840_p3 }
  0x12   :  { %850 = shalt.err (!%p847_p7)
}
  0x13   :  { %s971_s17 = smov 128   ;;  %s972_s18 = smov 8  }
  0x14   :  { %40 = dma.hbm_to_vmem [thread:$0]  %s1238_s1, 2560, %s35_s28, [#allocation6], %s971_s17, %s971_s17, %s972_s18  }
  0x15   :  { %s851_s23 = scalar_lea.hbm %s1241_s4, 2048 }
  0x16   :  { %p852_p8 = scmp.ne.s32.totalorder %s1241_s4, %s851_s23  ;;  %p855_p9 = scmp.lt.u32.totalorder %s851_s23, %s1241_s4 }
  0x18   :  { %p857_p10 = pnand %p855_p9, %p852_p8 }
  0x1a   :  { %860 = shalt.err (!%p857_p10)
}
  0x1b   :  { %s861_s29 = scalar_lea.vmem %s1028_s30, 2048  ;;  %p866_p12 = scmp.lt.s32.totalorder %s1028_s30, %s1028_s30 }
  0x1c   :  { %p862_p11 = scmp.ne.s32.totalorder %s1028_s30, %s861_s29  ;;  %p867_p13 = scmp.lt.s32.totalorder %s861_s29, %s861_s29 }
  0x1e   :  { %p868_p0 = por %p867_p13, %p866_p12 }
  0x20   :  { %p869_p1 = pnand %p868_p0, %p862_p11 }
  0x22   :  { %872 = shalt.err (!%p869_p1)
}
  0x23   :  { %66 = dma.hbm_to_vmem [thread:$0]  %s1241_s4, 2048, %s1028_s30, [#allocation9], %s971_s17, %s971_s17, %s972_s18  }
  0x24   :  { %s973_s9 = smov [#allocation2]   ;;  %s974_s11 = smov [#allocation7]  }
  0x25   :  { %s22_s10 = sshll.u32 %s973_s9, 4  ;;  %s48_s12 = sshll.u32 %s974_s11, 4  ;;  %s23_s10 = int_to_ptr.vmem [resolvable:$true] %s22_s10  ;;  %s1065_s12 = int_to_ptr.vmem [resolvable:$true] %s48_s12 }
  0x26   :  { %s873_s15 = scalar_lea.hbm %s1237_s0, 512 }
  0x27   :  { %p874_p2 = scmp.ne.s32.totalorder %s1237_s0, %s873_s15  ;;  %p877_p3 = scmp.lt.u32.totalorder %s873_s15, %s1237_s0 }
  0x29   :  { %p879_p4 = pnand %p877_p3, %p874_p2 }
  0x2b   :  { %882 = shalt.err (!%p879_p4)
}
  0x2c   :  { %s883_s4 = scalar_lea.vmem %s23_s10, 512  ;;  %p888_p6 = scmp.lt.s32.totalorder %s23_s10, %s23_s10 }
  0x2d   :  { %p884_p5 = scmp.ne.s32.totalorder %s23_s10, %s883_s4  ;;  %p889_p7 = scmp.lt.s32.totalorder %s883_s4, %s883_s4 }
  0x2f   :  { %p890_p8 = por %p889_p7, %p888_p6 }
  0x31   :  { %p891_p9 = pnand %p890_p8, %p884_p5 }
  0x33   :  { %894 = shalt.err (!%p891_p9)
}
  0x34   :  { %28 = dma.hbm_to_vmem [thread:$0]  %s1237_s0, 512, %s23_s10, [#allocation3], %s971_s17, %s971_s17, %s972_s18  }
  0x35   :  { %s895_s25 = scalar_lea.hbm %s1240_s3, 256 }
  0x36   :  { %p896_p10 = scmp.ne.s32.totalorder %s1240_s3, %s895_s25  ;;  %p899_p11 = scmp.lt.u32.totalorder %s895_s25, %s1240_s3 }
  0x38   :  { %p901_p12 = pnand %p899_p11, %p896_p10 }
  0x3a   :  { %904 = shalt.err (!%p901_p12)
}
  0x3b   :  { %s905_s28 = scalar_lea.vmem %s1065_s12, 256  ;;  %p910_p0 = scmp.lt.s32.totalorder %s1065_s12, %s1065_s12 }
  0x3c   :  { %p906_p13 = scmp.ne.s32.totalorder %s1065_s12, %s905_s28  ;;  %p911_p1 = scmp.lt.s32.totalorder %s905_s28, %s905_s28 }
  0x3e   :  { %p912_p2 = por %p911_p1, %p910_p0 }
  0x40   :  { %p913_p3 = pnand %p912_p2, %p906_p13 }
  0x42   :  { %916 = shalt.err (!%p913_p3)
}
  0x43   :  { %54 = dma.hbm_to_vmem [thread:$0]  %s1240_s3, 256, %s1065_s12, [#allocation6], %s971_s17, %s971_s17, %s972_s18  }
  0x44   :  { %s975_s10 = smov [#allocation10]   ;;  %s917_s15 = scalar_lea.hbm %s1243_s6, 2048 }
  0x45   :  { %s74_s11 = sshll.u32 %s975_s10, 4  ;;  %p918_p4 = scmp.ne.s32.totalorder %s1243_s6, %s917_s15  ;;  %s75_s11 = int_to_ptr.vmem [resolvable:$true] %s74_s11 }
  0x46   :  { %p921_p5 = scmp.lt.u32.totalorder %s917_s15, %s1243_s6 }
  0x48   :  { %p923_p6 = pnand %p921_p5, %p918_p4 }
  0x4a   :  { %926 = shalt.err (!%p923_p6)
}
  0x4b   :  { %s927_s4 = scalar_lea.vmem %s75_s11, 2048  ;;  %p932_p8 = scmp.lt.s32.totalorder %s75_s11, %s75_s11 }
  0x4c   :  { %p928_p7 = scmp.ne.s32.totalorder %s75_s11, %s927_s4  ;;  %p933_p9 = scmp.lt.s32.totalorder %s927_s4, %s927_s4 }
  0x4e   :  { %p934_p10 = por %p933_p9, %p932_p8 }
  0x50   :  { %p935_p11 = pnand %p934_p10, %p928_p7 }
  0x52   :  { %938 = shalt.err (!%p935_p11)
}
  0x53   :  { %80 = dma.hbm_to_vmem [thread:$0]  %s1243_s6, 2048, %s75_s11, [#allocation9], %s971_s17, %s971_s17, %s972_s18  }
  0x54   :  { %961 = dma.done.wait [#allocation3], 512  }
  0x55   :  { %962 = vsyncadd [#allocation3], 4294966784 }
  0x56   :  { %963 = dma.done.wait [#allocation6], 2816  }
  0x57   :  { %964 = vsyncadd [#allocation6], 4294964480 }
  0x58   :  { %965 = dma.done.wait [#allocation9], 4096  }
  0x59   :  { %966 = vsyncadd [#allocation9], 4294963200  ;;  %v976_v0 = vmov 0.0|0.0   ;;  %v1119_v1 = vld [vmem:[#allocation2] sm:$0xff]  ;;  %v1121_v2 = vld [vmem:[#allocation2 + $0x8] sm:$0xff]  ;;  %vm102_vm0 = vcmask 1046528  }
  0x5a   :  { %712 = vmatprep.subr.bf16.mxu0 %v976_v0  ;;  %742 = vmatprep.subr.bf16.mxu1 %v976_v0  ;;  %vm114_vm1 = vcmask 1044480   ;;  %vm108_vm2 = vcmask 1045504   ;;  %v1123_v3 = vld [vmem:[#allocation2 + $0x10] sm:$0xff]  ;;  %v103_v4 = vrot.slane %v1119_v1, 1  ;;  %v104_v5 = vrot.slane %v1121_v2, 1  ;;  %v1129_v8 = vld [vmem:[#allocation2 + $0x18] sm:$0xff] }
  0x5b   :  { %v115_v6 = vrot.slane %v1119_v1, 3  ;;  %v116_v7 = vrot.slane %v1121_v2, 3  ;;  %v109_v9 = vrot.slane %v1119_v1, 2  ;;  %v110_v10 = vrot.slane %v1121_v2, 2  ;;  %v208_v17 = vld [vmem:[#allocation5] sm:$0xff]  ;;  %v209_v18 = vld [vmem:[#allocation5 + $0x8] sm:$0xff] }
  0x5c   :  { %v161_v11 = vrot.slane %v1123_v3, 1  ;;  %v162_v12 = vrot.slane %v1129_v8, 1  ;;  %v105_v13 = vsel %vm102_vm0, %v103_v4, %v104_v5  ;;  %v107_v14 = vsel %vm102_vm0, %v104_v5, 0.0  ;;  %v210_v23 = vld [vmem:[#allocation5 + $0x10] sm:$0xff]  ;;  %v211_v24 = vld [vmem:[#allocation5 + $0x18] sm:$0xff]  ;;  %s977_s6 = smov 32  }
  0x5d   :  { %v117_v15 = vsel %vm114_vm1, %v115_v6, %v116_v7  ;;  %v119_v16 = vsel %vm114_vm1, %v116_v7, 0.0  ;;  %v804_v19 = vpack.i.bf16 %v107_v14, %v105_v13  ;;  %v111_v21 = vsel %vm108_vm2, %v109_v9, %v110_v10  ;;  %s978_s17 = smov 96   ;;  %v212_v33 = vld [vmem:[#allocation5 + $0x20] sm:$0xff]  ;;  %v213_v34 = vld [vmem:[#allocation5 + $0x28] sm:$0xff]  ;;  %s979_s18 = smov 64   ;;  %v214_v42 = vld [vmem:[#allocation5 + $0x30] sm:$0xff] }
  0x5e   :  { %v814_v20 = vpack.i.bf16 %v119_v16, %v117_v15  ;;  %v113_v22 = vsel %vm108_vm2, %v110_v10, 0.0  ;;  %v163_v26 = vsel %vm102_vm0, %v161_v11, %v162_v12  ;;  %v713_v27 = vpack.c.bf16 %v209_v18, %v208_v17  ;;  %v215_v43 = vld [vmem:[#allocation5 + $0x38] sm:$0xff]  ;;  %v216_v47 = vld [vmem:[#allocation5 + $0x40] sm:$0xff]  ;;  %v217_v48 = vld [vmem:[#allocation5 + $0x48] sm:$0xff]  ;;  %s982_s26 = smov [#allocation11]  }
  0x5f   :  { %805 = vrot.lane.b32.xlu0 %v804_v19, %s977_s6  ;;  %v809_v25 = vpack.i.bf16 %v113_v22, %v111_v21  ;;  %v166_v28 = vrot.slane %v1123_v3, 2  ;;  %v167_v29 = vrot.slane %v1129_v8, 2  ;;  %v171_v30 = vrot.slane %v1123_v3, 3  ;;  %v218_v51 = vld [vmem:[#allocation5 + $0x50] sm:$0xff]  ;;  %v219_v52 = vld [vmem:[#allocation5 + $0x58] sm:$0xff]  ;;  %v220_v54 = vld [vmem:[#allocation5 + $0x60] sm:$0xff] }
  0x60   :  { %815 = vrot.lane.b32.xlu1 %v814_v20, %s978_s17  ;;  %v172_v31 = vrot.slane %v1129_v8, 3  ;;  %714 = vmatpush1.bf16.msra.mxu0 %v713_v27  ;;  %v716_v32 = vpack.c.bf16 %v211_v24, %v210_v23  ;;  %vm120_vm3 = vcmask 1043456   ;;  %v121_v35 = vrot.slane %v1119_v1, 4  ;;  %v221_v55 = vld [vmem:[#allocation5 + $0x68] sm:$0xff]  ;;  %v222_v57 = vld [vmem:[#allocation5 + $0x70] sm:$0xff]  ;;  %v223_v58 = vld [vmem:[#allocation5 + $0x78] sm:$0xff] }
  0x61   :  { %715 = vmatprep.subr.bf16.mxu0 %v976_v0  ;;  %v122_v36 = vrot.slane %v1121_v2, 4  ;;  %v168_v37 = vsel %vm108_vm2, %v166_v28, %v167_v29  ;;  %v719_v39 = vpack.c.bf16 %v213_v34, %v212_v33  ;;  %vm147_vm4 = vcmask 261120   ;;  %v224_v60 = vld [vmem:[#allocation5 + $0x80] sm:$0xff]  ;;  %v225_v61 = vld [vmem:[#allocation5 + $0x88] sm:$0xff]  ;;  %v226_v63 = vld [vmem:[#allocation5 + $0x90] sm:$0xff] }
  0x62   :  { %v173_v38 = vsel %vm114_vm1, %v171_v30, %v172_v31  ;;  %v165_v44 = vsel %vm102_vm0, %v162_v12, 0.0  ;;  %v170_v45 = vsel %vm108_vm2, %v167_v29, 0.0  ;;  %v722_v46 = vpack.c.bf16 %v215_v43, %v214_v42  ;;  %v227_v4 = vld [vmem:[#allocation5 + $0x98] sm:$0xff]  ;;  %v394_v43 = vld [vmem:[#allocation8 + $0x30] sm:$0xff] }
  0x63   :  { %810 = vrot.lane.b32.xlu0 %v809_v25, %s979_s18  ;;  %v123_v40 = vsel %vm120_vm3, %v121_v35, %v122_v36  ;;  %v1156_v41 = vsel %vm120_vm3, %v122_v36, 0.0  ;;  %v175_v49 = vsel %vm114_vm1, %v172_v31, 0.0  ;;  %v725_v50 = vpack.c.bf16 %v217_v48, %v216_v47  ;;  %v388_v35 = vld [vmem:[#allocation8] sm:$0xff]  ;;  %v389_v36 = vld [vmem:[#allocation8 + $0x8] sm:$0xff] }
  0x64   :  { %182 = vrot.lane.b32.xlu1 %v163_v26, %s977_s6  ;;  %717 = vmatpush1.bf16.msra.mxu0 %v716_v32  ;;  %v728_v53 = vpack.c.bf16 %v219_v52, %v218_v51  ;;  %v731_v56 = vpack.c.bf16 %v221_v55, %v220_v54  ;;  %v734_v59 = vpack.c.bf16 %v223_v58, %v222_v57  ;;  %vm150_vm5 = vcmask 523264   ;;  %v397_v47 = vld [vmem:[#allocation8 + $0x48] sm:$0xff]  ;;  %v403_v57 = vld [vmem:[#allocation8 + $0x78] sm:$0xff] }
  0x65   :  { %718 = vmatprep.subr.bf16.mxu0 %v976_v0  ;;  %602 = vmatprep.mubr.msk.f32.mxu0 %vm147_vm4, %v123_v40  ;;  %v737_v62 = vpack.c.bf16 %v225_v61, %v224_v60  ;;  %v740_v5 = vpack.c.bf16 %v227_v4, %v226_v63  ;;  %vm153_vm6 = vcmask 785408   ;;  %v176_v18 = vrot.slane %v1123_v3, 4  ;;  %v392_v40 = vld [vmem:[#allocation8 + $0x20] sm:$0xff]  ;;  %v401_v54 = vld [vmem:[#allocation8 + $0x68] sm:$0xff] }
  0x66   :  { %v177_v19 = vrot.slane %v1129_v8, 4  ;;  %vm980_vm7 = vmmov 0   ;;  %v981_v51 = vmov 0.0   ;;  %vm386_vm8 = vcmask 1040384  }
  0x67   :  { %189 = vrot.lane.b32.xlu0 %v168_v37, %s979_s18  ;;  %v743_v37 = vpack.c.bf16 %v389_v36, %v388_v35  ;;  %674 = vmatprep.mubr.msk.f32.mxu1 %vm980_vm7, %v981_v51 }
  0x68   :  { %196 = vrot.lane.b32.xlu1 %v173_v38, %s978_s17  ;;  %720 = vmatpush1.bf16.msra.mxu0 %v719_v39  ;;  %v178_v26 = vsel %vm120_vm3, %v176_v18, %v177_v19  ;;  %v180_v31 = vsel %vm120_vm3, %v177_v19, 0.0  ;;  %v391_v38 = vld [vmem:[#allocation8 + $0x18] sm:$0xff] }
  0x69   :  { %721 = vmatprep.subr.bf16.mxu0 %v976_v0  ;;  %744 = vmatpush3.bf16.msra.mxu1 %v743_v37  ;;  %v366_v37 = vld [vmem:[#allocation7] sm:$0xff] }
  0x6a   :  { %745 = vmatprep.subr.bf16.mxu1 %v976_v0 }
  0x6b   :  { %184 = vrot.lane.b32.xlu0 %v165_v44, %s977_s6  ;;  %v395_v44 = vld [vmem:[#allocation8 + $0x38] sm:$0xff] }
  0x6c   :  { %191 = vrot.lane.b32.xlu1 %v170_v45, %s979_s18  ;;  %723 = vmatpush1.bf16.msra.mxu0 %v722_v46  ;;  %v752_v45 = vpack.c.bf16 %v395_v44, %v394_v43  ;;  %v396_v46 = vld [vmem:[#allocation8 + $0x40] sm:$0xff] }
  0x6d   :  { %724 = vmatprep.subr.bf16.mxu0 %v976_v0  ;;  %v755_v48 = vpack.c.bf16 %v397_v47, %v396_v46 }
  0x6f   :  { %198 = vrot.lane.b32.xlu0 %v175_v49, %s978_s17  ;;  %v398_v49 = vld [vmem:[#allocation8 + $0x50] sm:$0xff] }
  0x70   :  { %726 = vmatpush1.bf16.msra.mxu0 %v725_v50  ;;  %v399_v50 = vld [vmem:[#allocation8 + $0x58] sm:$0xff] }
  0x71   :  { %727 = vmatprep.subr.bf16.mxu0 %v976_v0  ;;  %v758_v52 = vpack.c.bf16 %v399_v50, %v398_v49 }
  0x74   :  { %729 = vmatpush1.bf16.msra.mxu0 %v728_v53  ;;  %v400_v53 = vld [vmem:[#allocation8 + $0x60] sm:$0xff] }
  0x75   :  { %730 = vmatprep.subr.bf16.mxu0 %v976_v0  ;;  %v761_v55 = vpack.c.bf16 %v401_v54, %v400_v53 }
  0x78   :  { %732 = vmatpush1.bf16.msra.mxu0 %v731_v56  ;;  %v402_v56 = vld [vmem:[#allocation8 + $0x70] sm:$0xff] }
  0x79   :  { %733 = vmatprep.subr.bf16.mxu0 %v976_v0  ;;  %v764_v58 = vpack.c.bf16 %v403_v57, %v402_v56 }
  0x7c   :  { %735 = vmatpush1.bf16.msra.mxu0 %v734_v59  ;;  %v601_v59 = vld [vmem:[%s1239_s2] ss:$0 sm:$0xff] }
  0x7d   :  { %736 = vmatprep.subr.bf16.mxu0 %v976_v0 }
  0x80   :  { %738 = vmatpush1.bf16.msra.mxu0 %v737_v62 }
  0x81   :  { %739 = vmatprep.subr.bf16.mxu0 %v976_v0 }
  0x84   :  { %741 = vmatpush1.bf16.msra.mxu0 %v740_v5 }
  0xd1   :  { %v806_v6 = vpop.permute.xlu0 %805 }
  0xd2   :  { %v816_v7 = vpop.permute.xlu1 %815  ;;  %v807_v9 = vunpack.i.l.bf16 %v806_v6  ;;  %v808_v10 = vunpack.i.h.bf16 %v806_v6 }
  0xd3   :  { %v817_v11 = vunpack.i.l.bf16 %v816_v7  ;;  %v818_v20 = vunpack.i.h.bf16 %v816_v7 }
  0xd4   :  { %v148_v16 = vsel %vm147_vm4, %v1119_v1, %v807_v9  ;;  %v149_v24 = vsel %vm147_vm4, %v1121_v2, %v808_v10 }
  0xd5   :  { %v811_v12 = vpop.permute.xlu0 %810 }
  0xd6   :  { %v183_v13 = vpop.permute.xlu1 %182  ;;  %v813_v14 = vunpack.i.h.bf16 %v811_v12  ;;  %v812_v15 = vunpack.i.l.bf16 %v811_v12 }
  0xd7   :  { %v202_v1 = vsel %vm147_vm4, %v1123_v3, %v183_v13 }
  0xd8   :  { %v151_v17 = vsel %vm150_vm5, %v148_v16, %v812_v15  ;;  %v152_v25 = vsel %vm150_vm5, %v149_v24, %v813_v14 }
  0xd9   :  { %v190_v21 = vpop.permute.xlu0 %189  ;;  %v154_v22 = vsel %vm153_vm6, %v151_v17, %v817_v11  ;;  %v155_v28 = vsel %vm153_vm6, %v152_v25, %v818_v20 }
  0xda   :  { %v197_v23 = vpop.permute.xlu1 %196  ;;  %310 = vmatmul.mubr.f32.vlgmr.msra.gmra.mrb[0].mxu0 %v154_v22  ;;  %v204_v29 = vsel %vm150_vm5, %v202_v1, %v190_v21 }
  0xdb   :  { %603 = vmatprep.mubr.msk.f32.mxu0 %vm147_vm4, %v1156_v41  ;;  %v206_v3 = vsel %vm153_vm6, %v204_v29, %v197_v23  ;;  %v393_v41 = vld [vmem:[#allocation8 + $0x28] sm:$0xff] }
  0xdc   :  { %v749_v42 = vpack.c.bf16 %v393_v41, %v392_v40 }
  0xdd   :  { %v185_v27 = vpop.permute.xlu0 %184 }
  0xde   :  { %315 = vmatmul.mubr.f32.gmra.mrb[2].mxu0 %v155_v28  ;;  %v203_v2 = vsel %vm147_vm4, %v1129_v8, %v185_v27  ;;  %v192_v30 = vpop.permute.xlu1 %191  ;;  %v390_v8 = vld [vmem:[#allocation8 + $0x10] sm:$0xff] }
  0xdf   :  { %604 = vmatprep.mubr.msk.f32.mxu0 %vm147_vm4, %v178_v26  ;;  %v205_v32 = vsel %vm150_vm5, %v203_v2, %v192_v30  ;;  %v746_v39 = vpack.c.bf16 %v391_v38, %v390_v8  ;;  %v367_v8 = vld [vmem:[#allocation7 + $0x8] sm:$0xff] }
  0xe1   :  { %v199_v33 = vpop.permute.xlu0 %198  ;;  %747 = vmatpush3.bf16.msra.mxu1 %v746_v39 }
  0xe2   :  { %320 = vmatmul.mubr.f32.gmra.mrb[4].mxu0 %v206_v3  ;;  %v207_v34 = vsel %vm153_vm6, %v205_v32, %v199_v33  ;;  %748 = vmatprep.subr.bf16.mxu1 %v976_v0 }
  0xe3   :  { %605 = vmatprep.mubr.msk.f32.mxu0 %vm147_vm4, %v180_v31 }
  0xe5   :  { %750 = vmatpush3.bf16.msra.mxu1 %v749_v42 }
  0xe6   :  { %325 = vmatmul.mubr.f32.gmra.mrb[6].mxu0 %v207_v34  ;;  %751 = vmatprep.subr.bf16.mxu1 %v976_v0 }
  0xe9   :  { %753 = vmatpush3.bf16.msra.mxu1 %v752_v45 }
  0xea   :  { %754 = vmatprep.subr.bf16.mxu1 %v976_v0 }
  0xed   :  { %756 = vmatpush3.bf16.msra.mxu1 %v755_v48 }
  0xee   :  { %757 = vmatprep.subr.bf16.mxu1 %v976_v0 }
  0xf1   :  { %759 = vmatpush3.bf16.msra.mxu1 %v758_v52 }
  0xf2   :  { %760 = vmatprep.subr.bf16.mxu1 %v976_v0 }
  0xf5   :  { %762 = vmatpush3.bf16.msra.mxu1 %v761_v55 }
  0xf6   :  { %763 = vmatprep.subr.bf16.mxu1 %v976_v0 }
  0xf9   :  { %765 = vmatpush3.bf16.msra.mxu1 %v764_v58 }
  0xfa   :  { %766 = vmatprep.subr.bf16.mxu1 %v976_v0 }
 0x1ad   :  { %v311_v60 = vpop.f32.mrb[0].mxu0 }
 0x1ae   :  { %v312_v61 = vadd.f32 %v601_v59, %v311_v60  ;;  %v313_v62 = vpop.f32.mrb[1].mxu0 }
 0x1b0   :  { %v334_v63 = vmul.f32 0.044715, %v312_v61  ;;  %v330_v32 = vmul.f32 0.5, %v312_v61 }
 0x1b1   :  { %v316_v4 = vpop.f32.mrb[2].mxu0 }
 0x1b2   :  { %v338_v5 = vmul.f32 %v334_v63, %v312_v61  ;;  %v317_v6 = vadd.f32 %v601_v59, %v316_v4  ;;  %v318_v7 = vpop.f32.mrb[3].mxu0  ;;  %v490_v63 = vld [vmem:[#allocation10] sm:$0xff]  ;;  %v491_v4 = vld [vmem:[#allocation10 + $0x8] sm:$0xff] }
 0x1b4   :  { %v342_v9 = vmul.f32 %v338_v5, %v312_v61  ;;  %v335_v10 = vmul.f32 0.044715, %v317_v6  ;;  %v331_v35 = vmul.f32 0.5, %v317_v6 }
 0x1b5   :  { %v321_v11 = vpop.f32.mrb[4].mxu0 }
 0x1b6   :  { %v346_v12 = vadd.f32 %v342_v9, %v312_v61  ;;  %v339_v13 = vmul.f32 %v335_v10, %v317_v6  ;;  %v322_v14 = vadd.f32 %v601_v59, %v321_v11  ;;  %v323_v15 = vpop.f32.mrb[5].mxu0  ;;  %v767_v9 = vpack.c.bf16 %v491_v4, %v490_v63  ;;  %v492_v11 = vld [vmem:[#allocation10 + $0x10] sm:$0xff] }
 0x1b7   :  { %v495_v15 = vld [vmem:[#allocation10 + $0x28] sm:$0xff] }
 0x1b8   :  { %v350_v16 = vmul.f32 0.7978846, %v346_v12  ;;  %v343_v17 = vmul.f32 %v339_v13, %v317_v6  ;;  %v336_v18 = vmul.f32 0.044715, %v322_v14  ;;  %v332_v43 = vmul.f32 0.5, %v322_v14  ;;  %v493_v12 = vld [vmem:[#allocation10 + $0x18] sm:$0xff] }
 0x1b9   :  { %v326_v19 = vpop.f32.mrb[6].mxu0  ;;  %v770_v13 = vpack.c.bf16 %v493_v12, %v492_v11 }
 0x1ba   :  { %819 = vtanh.f32 %v350_v16  ;;  %v347_v20 = vadd.f32 %v343_v17, %v317_v6  ;;  %v340_v21 = vmul.f32 %v336_v18, %v322_v14  ;;  %v327_v22 = vadd.f32 %v601_v59, %v326_v19  ;;  %v328_v23 = vpop.f32.mrb[7].mxu0  ;;  %v496_v17 = vld [vmem:[#allocation10 + $0x30] sm:$0xff]  ;;  %v497_v18 = vld [vmem:[#allocation10 + $0x38] sm:$0xff] }
 0x1bb   :  { %v776_v19 = vpack.c.bf16 %v497_v18, %v496_v17  ;;  %v501_v23 = vld [vmem:[#allocation10 + $0x58] sm:$0xff] }
 0x1bc   :  { %v351_v24 = vmul.f32 0.7978846, %v347_v20  ;;  %v344_v25 = vmul.f32 %v340_v21, %v322_v14  ;;  %v337_v1 = vmul.f32 0.044715, %v327_v22  ;;  %v333_v47 = vmul.f32 0.5, %v327_v22  ;;  %v498_v20 = vld [vmem:[#allocation10 + $0x40] sm:$0xff] }
 0x1be   :  { %821 = vtanh.f32 %v351_v24  ;;  %v348_v26 = vadd.f32 %v344_v25, %v322_v14  ;;  %v341_v27 = vmul.f32 %v337_v1, %v327_v22  ;;  %v494_v14 = vld [vmem:[#allocation10 + $0x20] sm:$0xff]  ;;  %v503_v1 = vld [vmem:[#allocation10 + $0x68] sm:$0xff] }
 0x1bf   :  { %v773_v16 = vpack.c.bf16 %v495_v15, %v494_v14  ;;  %v502_v25 = vld [vmem:[#allocation10 + $0x60] sm:$0xff] }
 0x1c0   :  { %v352_v28 = vmul.f32 0.7978846, %v348_v26  ;;  %v345_v29 = vmul.f32 %v341_v27, %v327_v22  ;;  %v785_v26 = vpack.c.bf16 %v503_v1, %v502_v25  ;;  %v504_v27 = vld [vmem:[#allocation10 + $0x70] sm:$0xff] }
 0x1c2   :  { %823 = vtanh.f32 %v352_v28  ;;  %v349_v2 = vadd.f32 %v345_v29, %v327_v22  ;;  %v500_v22 = vld [vmem:[#allocation10 + $0x50] sm:$0xff]  ;;  %v505_v28 = vld [vmem:[#allocation10 + $0x78] sm:$0xff] }
 0x1c3   :  { %v782_v24 = vpack.c.bf16 %v501_v23, %v500_v22  ;;  %v788_v29 = vpack.c.bf16 %v505_v28, %v504_v27 }
 0x1c4   :  { %v820_v30 = vpop.eup %819  ;;  %v353_v31 = vmul.f32 0.7978846, %v349_v2  ;;  %v606_v2 = vld [vmem:[%s1242_s5] ss:$0 sm:$0xff]  ;;  %s590_s5 = sshll.u32 %s982_s26, 4  ;;  %s591_s5 = int_to_ptr.vmem [resolvable:$true] %s590_s5 }
 0x1c5   :  { %v358_v3 = vadd.f32 1.0, %v820_v30  ;;  %s939_s27 = scalar_lea.vmem %s591_s5, 32  ;;  %p944_p13 = scmp.lt.s32.totalorder %s591_s5, %s591_s5 }
 0x1c6   :  { %825 = vtanh.f32 %v353_v31  ;;  %p940_p12 = scmp.ne.s32.totalorder %s591_s5, %s939_s27  ;;  %p945_p0 = scmp.lt.s32.totalorder %s939_s27, %s939_s27 }
 0x1c7   :  { %v362_v34 = vmul.f32 %v358_v3, %v330_v32 }
 0x1c8   :  { %v822_v33 = vpop.eup %821  ;;  %p946_p1 = por %p945_p0, %p944_p13 }
 0x1c9   :  { %v359_v36 = vadd.f32 1.0, %v822_v33  ;;  %v368_v41 = vadd.f32 %v366_v37, %v362_v34 }
 0x1ca   :  { %p947_p2 = pnand %p946_p1, %p940_p12 }
 0x1cb   :  { %v363_v38 = vmul.f32 %v359_v36, %v331_v35 }
 0x1cc   :  { %v824_v39 = vpop.eup %823 }
 0x1cd   :  { %v360_v40 = vadd.f32 1.0, %v824_v39  ;;  %v369_v42 = vadd.f32 %v367_v8, %v363_v38 }
 0x1cf   :  { %v370_v44 = vmax.f32 %v368_v41, %v369_v42  ;;  %v364_v46 = vmul.f32 %v360_v40, %v332_v43 }
 0x1d0   :  { %v826_v45 = vpop.eup %825 }
 0x1d1   :  { %v361_v48 = vadd.f32 1.0, %v826_v45  ;;  %v371_v49 = vrot.slane %v370_v44, 4  ;;  %v377_v53 = vadd.f32 %v366_v37, %v364_v46 }
 0x1d3   :  { %v365_v50 = vmul.f32 %v361_v48, %v333_v47  ;;  %v372_v52 = vmax.f32 %v370_v44, %v371_v49 }
 0x1d5   :  { %v378_v54 = vadd.f32 %v367_v8, %v365_v50  ;;  %v373_v55 = vrot.slane %v372_v52, 2 }
 0x1d7   :  { %v379_v56 = vmax.f32 %v377_v53, %v378_v54  ;;  %v374_v58 = vmax.f32 %v372_v52, %v373_v55 }
 0x1d9   :  { %v380_v57 = vrot.slane %v379_v56, 4  ;;  %v375_v61 = vrot.slane %v374_v58, 1 }
 0x1db   :  { %v381_v59 = vmax.f32 %v379_v56, %v380_v57  ;;  %v376_v6 = vmax.f32 %v374_v58, %v375_v61 }
 0x1dd   :  { %v382_v60 = vrot.slane %v381_v59, 2 }
 0x1df   :  { %v383_v62 = vmax.f32 %v381_v59, %v382_v60 }
 0x1e1   :  { %v384_v5 = vrot.slane %v383_v62, 1 }
 0x1e3   :  { %v385_v7 = vmax.f32 %v383_v62, %v384_v5 }
 0x1e5   :  { %v387_v10 = vsel %vm386_vm8, %v376_v6, %v385_v7 }
 0x1e6   :  { %675 = vmatmul.mubr.f32.vlgmr.msra.gmra.mrb[0].mxu1 %v387_v10 }
 0x1e7   :  { %768 = vmatpush3.bf16.msra.mxu1 %v767_v9  ;;  %709 = vmatprep.mubr.msk.f32.mxu1 %vm980_vm7, %v981_v51  ;;  %v499_v51 = vld [vmem:[#allocation10 + $0x48] sm:$0xff] }
 0x1e8   :  { %769 = vmatprep.subr.bf16.mxu1 %v976_v0  ;;  %v779_v21 = vpack.c.bf16 %v499_v51, %v498_v20 }
 0x1eb   :  { %771 = vmatpush3.bf16.msra.mxu1 %v770_v13 }
 0x1ec   :  { %772 = vmatprep.subr.bf16.mxu1 %v976_v0 }
 0x1ef   :  { %774 = vmatpush3.bf16.msra.mxu1 %v773_v16 }
 0x1f0   :  { %775 = vmatprep.subr.bf16.mxu1 %v976_v0 }
 0x1f3   :  { %777 = vmatpush3.bf16.msra.mxu1 %v776_v19 }
 0x1f4   :  { %778 = vmatprep.subr.bf16.mxu1 %v976_v0 }
 0x1f7   :  { %780 = vmatpush3.bf16.msra.mxu1 %v779_v21 }
 0x1f8   :  { %781 = vmatprep.subr.bf16.mxu1 %v976_v0 }
 0x1fb   :  { %783 = vmatpush3.bf16.msra.mxu1 %v782_v24 }
 0x1fc   :  { %784 = vmatprep.subr.bf16.mxu1 %v976_v0 }
 0x1ff   :  { %786 = vmatpush3.bf16.msra.mxu1 %v785_v26 }
 0x200   :  { %787 = vmatprep.subr.bf16.mxu1 %v976_v0  ;;  %v607_v0 = vld [vmem:[%s1244_s7] ss:$0 sm:$0xff] }
 0x203   :  { %789 = vmatpush3.bf16.msra.mxu1 %v788_v29 }
 0x2b9   :  { %v477_v30 = vpop.f32.mrb[0].mxu1 }
 0x2ba   :  { %v478_v31 = vadd.f32 %v606_v2, %v477_v30  ;;  %v676_v3 = vpop.f32.mrb[1].mxu1 }
 0x2bc   :  { %v482_v32 = vmul.f32 0.044715, %v478_v31  ;;  %v481_v8 = vmul.f32 0.5, %v478_v31 }
 0x2be   :  { %v483_v33 = vmul.f32 %v482_v32, %v478_v31 }
 0x2c0   :  { %v484_v34 = vmul.f32 %v483_v33, %v478_v31 }
 0x2c2   :  { %v485_v35 = vadd.f32 %v484_v34, %v478_v31 }
 0x2c4   :  { %v486_v36 = vmul.f32 0.7978846, %v485_v35 }
 0x2c6   :  { %827 = vtanh.f32 %v486_v36 }
 0x2d0   :  { %v828_v37 = vpop.eup %827 }
 0x2d1   :  { %v488_v38 = vadd.f32 1.0, %v828_v37 }
 0x2d3   :  { %v489_v39 = vmul.f32 %v488_v38, %v481_v8 }
 0x2d5   :  { %710 = vmatmul.mubr.f32.vlgmr.msra.gmra.mrb[2].mxu1 %v489_v39 }
 0x3a8   :  { %v579_v40 = vpop.f32.mrb[2].mxu1 }
 0x3a9   :  { %v580_v41 = vadd.f32 %v607_v0, %v579_v40  ;;  %v711_v42 = vpop.f32.mrb[3].mxu1 }
 0x3ab   :  { %583 = vst [vmem:[#allocation11] sm:$0x3] %v580_v41 }
 0x3ac   :  { %950 = shalt.err (!%p947_p2)
}
 0x3ad   :  { %s951_s28 = scalar_lea.hbm %s1245_s8, 32 }
 0x3ae   :  { %p952_p3 = scmp.ne.s32.totalorder %s1245_s8, %s951_s28  ;;  %p955_p4 = scmp.lt.u32.totalorder %s951_s28, %s1245_s8 }
 0x3b0   :  { %p957_p5 = pnand %p955_p4, %p952_p3 }
 0x3b2   :  { %960 = shalt.err (!%p957_p5)
}
 0x3b3   :  { %593 = dma.vmem_to_hbm [thread:$0]  %s591_s5, 32, %s1245_s8, [#allocation4]  }
 0x3b4   :  { %967 = dma.done.wait [#allocation4], 32  }
 0x3b5   :  { %968 = vsyncadd [#allocation4], 4294967264 }
 0x3b6   :  { %597 = vsyncpa [#allocation3], 1 }
 0x3b7   :  { %598 = vsyncpa [#allocation6], 1 }
 0x3b8   :  { %599 = vsyncpa [#allocation9], 1 }
 0x3b9   :  { %600 = vsyncpa [#allocation4], 1 }

</bundles_post_ra>
